<compile_context>
chip_gen: v7x
topology: tpu7x:2x2x1
jax: 0.10.0
libtpu: 0.0.40
codegen_flags: <defaults>
</compile_context>

<pallas_src>
import functools

import jax
import jax.numpy as jnp
from jax.experimental import pallas as pl
from jax.experimental.pallas import tpu as pltpu

_LANE = 128
_SUBL_BF16 = 16  # bf16 sublane packing


def _round_up(v, m):
    return ((v + m - 1) // m) * m


def _encoder_kernel(x_ref, w_ref, b_ref, eps_ref, out_ref, *,
                    d_in, wmax, latent, off2, off3, out_w):
    bf16 = jnp.bfloat16
    f32 = jnp.float32

    x = x_ref[...].astype(bf16)       # (TB, d_in)       bf16 for the MXU
    w = w_ref[...]                    # (rows, wmax)     bf16, zero-padded packing
    b = b_ref[...]                    # (3, wmax)        f32, zero-padded packing
    eps = eps_ref[...]                # (TB, latent)     f32

    # fc1 + relu — full padded lane width; lanes >= h0 are exactly 0.
    a1 = jnp.dot(x, w[0:d_in, :], preferred_element_type=f32) + b[0:1, :]
    a1 = jnp.maximum(a1, 0.0)

    # fc2 + relu — K = wmax with zero-padded rows/lanes, still exact.
    a2 = jnp.dot(a1.astype(bf16), w[off2:off2 + wmax, :],
                 preferred_element_type=f32) + b[1:2, :]
    a2 = jnp.maximum(a2, 0.0)

    # fused fc3|fc4 head -> ms = [ mu | sigma | 0-pad ]
    ms = jnp.dot(a2.astype(bf16), w[off3:off3 + wmax, :],
                 preferred_element_type=f32) + b[2:3, :]

    mu = ms[:, 0:latent]
    sigma = ms[:, latent:2 * latent]

    # reparameterization (f32 epilogue — safe on v5e)
    z = mu + sigma * eps

    # per-row partial KL exactly as written in the PyTorch module:
    #   -0.5 * sum(1 + sigma - mu^2 - exp(sigma))
    # (latent-axis reduce here; batch reduce finishes in the wrapper so it
    #  stays correct across grid blocks)
    kl_row = -0.5 * jnp.sum(1.0 + sigma - mu * mu - jnp.exp(sigma),
                            axis=-1, keepdims=True)

    pad = jnp.zeros((z.shape[0], out_w - 3 * latent - 1), f32)
    # single lane-dense store: [ mu | sigma | z | kl_row | pad ]
    out_ref[...] = jnp.concatenate([ms[:, 0:2 * latent], z, kl_row, pad],
                                   axis=-1)


def pack_params(params):
    """One-time host-side packing: fuse the mu/sigma head, pack all weights into
    one lane-dense bf16 buffer (row-stacked, zero padded to 128 lanes) and all
    biases into one f32 buffer."""
    w1, b1, w2, b2, w3, b3, w4, b4 = params
    d_in, h0 = w1.shape
    h1 = w2.shape[1]
    latent = w3.shape[1]

    # common padded lane width for every layer output (>= 128, lane-dense)
    wmax = max(_round_up(h0, _LANE), _round_up(h1, _LANE),
               _round_up(2 * latent, _LANE))

    # row offsets: each layer's K-slab is wmax rows so the full-width matmuls
    # read only that layer's (zero-padded) rows; offsets sublane-aligned.
    off2 = _round_up(d_in, _SUBL_BF16)
    off3 = off2 + wmax
    rows = _round_up(off3 + wmax, _SUBL_BF16)

    w34 = jnp.concatenate([w3, w4], axis=1)                     # (h1, 2L)
    b34 = jnp.concatenate([b3.reshape(-1), b4.reshape(-1)], axis=0)

    wp = jnp.zeros((rows, wmax), jnp.float32)
    wp = wp.at[0:d_in, 0:h0].set(w1)
    wp = wp.at[off2:off2 + h0, 0:h1].set(w2)
    wp = wp.at[off3:off3 + h1, 0:2 * latent].set(w34)
    wp = wp.astype(jnp.bfloat16)

    bp = jnp.zeros((3, wmax), jnp.float32)
    bp = bp.at[0, 0:h0].set(b1.reshape(-1))
    bp = bp.at[1, 0:h1].set(b2.reshape(-1))
    bp = bp.at[2, 0:2 * latent].set(b34)

    out_w = _round_up(3 * latent + 1, _LANE)
    dims = dict(d_in=d_in, wmax=wmax, latent=latent,
                off2=off2, off3=off3, out_w=out_w)
    return wp, bp, dims


def _pick_block_rows(batch):
    # Target up to 256 rows per block (amortizes per-step overhead, feeds the
    # 256-wide MXU on v6e/v7x); always a multiple of 8 sublanes.
    if batch <= 256:
        return max(8, _round_up(batch, 8))
    return 256


def encoder_forward(x, packed, eps):
    """VAE encoder forward as a single Pallas kernel.

    Returns (z, mu, sigma, kl) with kl a scalar.
    """
    w_packed, b_packed, dims = packed
    d_in = dims["d_in"]
    latent = dims["latent"]
    out_w = dims["out_w"]

    B = x.shape[0]
    tb = _pick_block_rows(B)
    Bp = _round_up(B, tb)
    if Bp != B:
        x = jnp.pad(x, ((0, Bp - B), (0, 0)))
        eps = jnp.pad(eps, ((0, Bp - B), (0, 0)))
    grid = (Bp // tb,)

    kernel = functools.partial(_encoder_kernel, **dims)

    out = pl.pallas_call(
        kernel,
        out_shape=jax.ShapeDtypeStruct((Bp, out_w), jnp.float32),
        grid_spec=pltpu.PrefetchScalarGridSpec(
            num_scalar_prefetch=0,
            grid=grid,
            in_specs=[
                pl.BlockSpec((tb, d_in), lambda i: (i, 0)),
                # weights / biases: constant block index -> stay VMEM-resident
                pl.BlockSpec(w_packed.shape, lambda i: (0, 0)),
                pl.BlockSpec(b_packed.shape, lambda i: (0, 0)),
                pl.BlockSpec((tb, latent), lambda i: (i, 0)),
            ],
            out_specs=pl.BlockSpec((tb, out_w), lambda i: (i, 0)),
        ),
        compiler_params=pltpu.CompilerParams(
            dimension_semantics=("parallel",)),
    )(x, w_packed, b_packed, eps)

    out = out[:B]
    mu = out[:, 0:latent]
    sigma = out[:, latent:2 * latent]
    z = out[:, 2 * latent:3 * latent]
    kl = jnp.sum(out[:, 3 * latent])      # finish the tiny batch reduce here
    return z, mu, sigma, kl


def init_params(key, input_dim, hidden_dims, latent_dim):
    """Deterministic synthetic parameters (weights stored as (in, out))."""
    dims = [(input_dim, hidden_dims[0]),
            (hidden_dims[0], hidden_dims[1]),
            (hidden_dims[1], latent_dim),
            (hidden_dims[1], latent_dim)]
    params = []
    for i, (fan_in, fan_out) in enumerate(dims):
        kw, kb = jax.random.split(jax.random.fold_in(key, i))
        scale = 1.0 / jnp.sqrt(jnp.float32(fan_in))
        w = jax.random.uniform(kw, (fan_in, fan_out), jnp.float32, -scale, scale)
        b = jax.random.uniform(kb, (1, fan_out), jnp.float32, -scale, scale)
        params += [w, b]
    return tuple(params)


def reference_forward(x, params, eps):
    """Pure-JAX reference using the same bf16-matmul / f32-accumulate numerics
    as the kernel (the bf16 weight cast is part of the chosen implementation)."""
    w1, b1, w2, b2, w3, b3, w4, b4 = params
    bf = jnp.bfloat16

    def lin(a, w, b):
        return jnp.dot(a.astype(bf), w.astype(bf),
                       preferred_element_type=jnp.float32) + b

    h1 = jnp.maximum(lin(x, w1, b1), 0.0)
    h2 = jnp.maximum(lin(h1, w2, b2), 0.0)
    mu = lin(h2, w3, b3)
    sigma = lin(h2, w4, b4)
    z = mu + sigma * eps
    # NOTE: faithfully reproduces the module's KL (sigma used both as std-dev
    # in the reparameterization and as log-variance-like term in the KL).
    kl = -0.5 * jnp.sum(1.0 + sigma - mu ** 2 - jnp.exp(sigma))
    return z, mu, sigma, kl


if __name__ == "__main__":
    # Small shapes consistent with the module's forward: x is (batch, input_dim).
    batch = 8
    input_dim = 32
    hidden_dims = [64, 32]
    latent_dim = 16

    key = jax.random.PRNGKey(0)
    kx, keps, kp = jax.random.split(key, 3)

    x = jax.random.normal(kx, (batch, input_dim), jnp.float32)
    eps = jax.random.normal(keps, (batch, latent_dim), jnp.float32)
    params = init_params(kp, input_dim, hidden_dims, latent_dim)

    packed = pack_params(params)   # one-time host-side packing
    z, mu, sigma, kl = encoder_forward(x, packed, eps)
    jax.block_until_ready((z, mu, sigma, kl))

    # sanity check against the matched pure-JAX reference
    z_ref, mu_ref, sigma_ref, kl_ref = reference_forward(x, params, eps)
    assert jnp.allclose(mu, mu_ref, atol=2e-3, rtol=2e-3)
    assert jnp.allclose(sigma, sigma_ref, atol=2e-3, rtol=2e-3)
    assert jnp.allclose(z, z_ref, atol=2e-3, rtol=2e-3)
    assert jnp.allclose(kl, kl_ref, atol=1e-2, rtol=1e-3)

    print("KERNEL_OK")
</pallas_src>

<mosaic_0001>
module attributes {stable_mosaic.version = 11 : i64} {
  func.func @_encoder_kernel(%arg0: i32, %arg1: memref<8x32xf32, #tpu.memory_space<vmem>>, %arg2: memref<288x128xbf16, #tpu.memory_space<vmem>>, %arg3: memref<3x128xf32, #tpu.memory_space<vmem>>, %arg4: memref<8x16xf32, #tpu.memory_space<vmem>>, %arg5: memref<8x128xf32, #tpu.memory_space<vmem>>) attributes {dimension_semantics = [#tpu.dimension_semantics<parallel>], iteration_bounds = array<i64: 1>, scalar_prefetch = 0 : i64, scratch_operands = 0 : i64, tpu.core_type = #tpu.core_type<tc>, window_params = [{transform_indices = @transform_0, window_bounds = array<i64: 8, 32>}, {pipeline_mode = #tpu.pipeline_mode<synchronous>, transform_indices = @transform_1, window_bounds = array<i64: 288, 128>}, {pipeline_mode = #tpu.pipeline_mode<synchronous>, transform_indices = @transform_2, window_bounds = array<i64: 3, 128>}, {transform_indices = @transform_3, window_bounds = array<i64: 8, 16>}, {transform_indices = @transform_4, window_bounds = array<i64: 8, 128>}]} {
    %c0 = arith.constant 0 : index
    %c0_0 = arith.constant 0 : index
    %0 = vector.load %arg1[%c0, %c0_0] : memref<8x32xf32, #tpu.memory_space<vmem>>, vector<8x32xf32>
    %1 = arith.truncf %0 : vector<8x32xf32> to vector<8x32xbf16>
    %c0_1 = arith.constant 0 : index
    %c0_2 = arith.constant 0 : index
    %2 = vector.load %arg2[%c0_1, %c0_2] : memref<288x128xbf16, #tpu.memory_space<vmem>>, vector<288x128xbf16>
    %c0_3 = arith.constant 0 : index
    %c0_4 = arith.constant 0 : index
    %3 = vector.load %arg3[%c0_3, %c0_4] : memref<3x128xf32, #tpu.memory_space<vmem>>, vector<3x128xf32>
    %c0_5 = arith.constant 0 : index
    %c0_6 = arith.constant 0 : index
    %4 = vector.load %arg4[%c0_5, %c0_6] : memref<8x16xf32, #tpu.memory_space<vmem>>, vector<8x16xf32>
    %5 = vector.extract_strided_slice %2 {offsets = [0, 0], sizes = [32, 128], strides = [1, 1]} : vector<288x128xbf16> to vector<32x128xbf16>
    %cst = arith.constant dense<0.000000e+00> : vector<8x128xf32>
    %6 = tpu.matmul %1, %5, %cst {dimension_numbers = #tpu.dot_dimension_numbers<[1], [0], [0], [1], [0, 0, 1, 1], [], []>} : vector<8x32xbf16>, vector<32x128xbf16>, vector<8x128xf32> -> vector<8x128xf32>
    %7 = vector.extract_strided_slice %3 {offsets = [0, 0], sizes = [1, 128], strides = [1, 1]} : vector<3x128xf32> to vector<1x128xf32>
    %8 = vector.broadcast %7 : vector<1x128xf32> to vector<8x128xf32>
    %9 = arith.addf %6, %8 : vector<8x128xf32>
    %cst_7 = arith.constant 0.000000e+00 : f32
    %10 = vector.broadcast %cst_7 : f32 to vector<8x128xf32>
    %11 = arith.maximumf %9, %10 : vector<8x128xf32>
    %12 = arith.truncf %11 : vector<8x128xf32> to vector<8x128xbf16>
    %13 = vector.extract_strided_slice %2 {offsets = [32, 0], sizes = [128, 128], strides = [1, 1]} : vector<288x128xbf16> to vector<128x128xbf16>
    %cst_8 = arith.constant dense<0.000000e+00> : vector<8x128xf32>
    %14 = tpu.matmul %12, %13, %cst_8 {dimension_numbers = #tpu.dot_dimension_numbers<[1], [0], [0], [1], [0, 0, 1, 1], [], []>} : vector<8x128xbf16>, vector<128x128xbf16>, vector<8x128xf32> -> vector<8x128xf32>
    %15 = vector.extract_strided_slice %3 {offsets = [1, 0], sizes = [1, 128], strides = [1, 1]} : vector<3x128xf32> to vector<1x128xf32>
    %16 = vector.broadcast %15 : vector<1x128xf32> to vector<8x128xf32>
    %17 = arith.addf %14, %16 : vector<8x128xf32>
    %cst_9 = arith.constant 0.000000e+00 : f32
    %18 = vector.broadcast %cst_9 : f32 to vector<8x128xf32>
    %19 = arith.maximumf %17, %18 : vector<8x128xf32>
    %20 = arith.truncf %19 : vector<8x128xf32> to vector<8x128xbf16>
    %21 = vector.extract_strided_slice %2 {offsets = [160, 0], sizes = [128, 128], strides = [1, 1]} : vector<288x128xbf16> to vector<128x128xbf16>
    %cst_10 = arith.constant dense<0.000000e+00> : vector<8x128xf32>
    %22 = tpu.matmul %20, %21, %cst_10 {dimension_numbers = #tpu.dot_dimension_numbers<[1], [0], [0], [1], [0, 0, 1, 1], [], []>} : vector<8x128xbf16>, vector<128x128xbf16>, vector<8x128xf32> -> vector<8x128xf32>
    %23 = vector.extract_strided_slice %3 {offsets = [2, 0], sizes = [1, 128], strides = [1, 1]} : vector<3x128xf32> to vector<1x128xf32>
    %24 = vector.broadcast %23 : vector<1x128xf32> to vector<8x128xf32>
    %25 = arith.addf %22, %24 : vector<8x128xf32>
    %26 = vector.extract_strided_slice %25 {offsets = [0, 0], sizes = [8, 16], strides = [1, 1]} : vector<8x128xf32> to vector<8x16xf32>
    %27 = vector.extract_strided_slice %25 {offsets = [0, 16], sizes = [8, 16], strides = [1, 1]} : vector<8x128xf32> to vector<8x16xf32>
    %28 = arith.mulf %27, %4 : vector<8x16xf32>
    %29 = arith.addf %26, %28 : vector<8x16xf32>
    %cst_11 = arith.constant 1.000000e+00 : f32
    %30 = vector.broadcast %cst_11 : f32 to vector<8x16xf32>
    %31 = arith.addf %30, %27 : vector<8x16xf32>
    %32 = arith.mulf %26, %26 : vector<8x16xf32>
    %33 = arith.subf %31, %32 : vector<8x16xf32>
    %34 = math.exp %27 : vector<8x16xf32>
    %35 = arith.subf %33, %34 : vector<8x16xf32>
    %cst_12 = arith.constant dense<0.000000e+00> : vector<8xf32>
    %36 = vector.multi_reduction <add>, %35, %cst_12 [1] : vector<8x16xf32> to vector<8xf32>
    %37 = vector.shape_cast %36 : vector<8xf32> to vector<8x1xf32>
    %cst_13 = arith.constant -5.000000e-01 : f32
    %38 = vector.broadcast %cst_13 : f32 to vector<8x1xf32>
    %39 = arith.mulf %38, %37 : vector<8x1xf32>
    %cst_14 = arith.constant 0.000000e+00 : f32
    %40 = vector.broadcast %cst_14 : f32 to vector<8x79xf32>
    %41 = vector.extract_strided_slice %25 {offsets = [0, 0], sizes = [8, 32], strides = [1, 1]} : vector<8x128xf32> to vector<8x32xf32>
    %42 = tpu.concatenate %41, %29, %39, %40 in 1 : vector<8x32xf32>, vector<8x16xf32>, vector<8x1xf32>, vector<8x79xf32> -> vector<8x128xf32>
    %c0_15 = arith.constant 0 : index
    %c0_16 = arith.constant 0 : index
    %43 = vector.load %arg5[%c0_15, %c0_16] : memref<8x128xf32, #tpu.memory_space<vmem>>, vector<8x128xf32>
    tpu.vector_store %arg5[%c0_15, %c0_16], %42 {strides = array<i32>} : memref<8x128xf32, #tpu.memory_space<vmem>>, vector<8x128xf32>,
    return
  }
  func.func @transform_0(%arg0: i32) -> (i32, i32) {
    %c0_i32 = arith.constant 0 : i32
    %c0_i32_0 = arith.constant 0 : i32
    return %arg0, %c0_i32 : i32, i32
  }
  func.func @transform_1(%arg0: i32) -> (i32, i32) {
    %c0_i32 = arith.constant 0 : i32
    %c0_i32_0 = arith.constant 0 : i32
    %c0_i32_1 = arith.constant 0 : i32
    return %c0_i32, %c0_i32_0 : i32, i32
  }
  func.func @transform_2(%arg0: i32) -> (i32, i32) {
    %c0_i32 = arith.constant 0 : i32
    %c0_i32_0 = arith.constant 0 : i32
    %c0_i32_1 = arith.constant 0 : i32
    return %c0_i32, %c0_i32_0 : i32, i32
  }
  func.func @transform_3(%arg0: i32) -> (i32, i32) {
    %c0_i32 = arith.constant 0 : i32
    %c0_i32_0 = arith.constant 0 : i32
    return %arg0, %c0_i32 : i32, i32
  }
  func.func @transform_4(%arg0: i32) -> (i32, i32) {
    %c0_i32 = arith.constant 0 : i32
    %c0_i32_0 = arith.constant 0 : i32
    return %arg0, %c0_i32 : i32, i32
  }
}

</mosaic_0001>

<bundles_post_ra>
// kernel: tpu_custom_call.1
= control target key start
LH: loop header
LB: loop body
LE: loop exit
PB: predicated region body
PF: predicated region fallthrough
CT: control target
= control target key end

     0   :  { %9 = vsyncpa [#allocation3], 0  ;;  %s725_s0 = inlined_call_operand.hbm [shape: f32[8,32], index: 0, kind: input, shape index: {}]   ;;  %s726_s1 = inlined_call_operand.hbm [shape: bf16[288,128], index: 1, kind: input, shape index: {}]   ;;  %s727_s2 = inlined_call_operand.hbm [shape: f32[3,128], index: 2, kind: input, shape index: {}]   ;;  %s728_s3 = inlined_call_operand.vmem [shape: f32[8,16], index: 3, kind: input, shape index: {}]   ;;  %s729_s4 = inlined_call_operand.hbm [shape: f32[8,128], index: 4, kind: output, shape index: {}]  }
   0x1   :  { %10 = vsyncpa [#allocation6], 0 }
   0x2   :  { %11 = vsyncpa [#allocation4], 0  ;;  %s612_s15 = smov [#allocation5]   ;;  %s518_s19 = scalar_lea.hbm %s726_s1, 2304 }
   0x3   :  { %s27_s16 = sshll.u32 %s612_s15, 4  ;;  %p519_p0 = scmp.ne.s32.totalorder %s726_s1, %s518_s19  ;;  %s28_s16 = int_to_ptr.vmem [resolvable:$true] %s27_s16 }
   0x4   :  { %p522_p1 = scmp.lt.u32.totalorder %s518_s19, %s726_s1 }
   0x6   :  { %p524_p2 = pnand %p522_p1, %p519_p0 }
   0x8   :  { %527 = shalt.err (!%p524_p2)
}
   0x9   :  { %s528_s24 = scalar_lea.vmem %s28_s16, 2304  ;;  %p533_p4 = scmp.lt.s32.totalorder %s28_s16, %s28_s16 }
   0xa   :  { %p529_p3 = scmp.ne.s32.totalorder %s28_s16, %s528_s24  ;;  %p534_p5 = scmp.lt.s32.totalorder %s528_s24, %s528_s24 }
   0xc   :  { %p535_p6 = por %p534_p5, %p533_p4 }
   0xe   :  { %p536_p7 = pnand %p535_p6, %p529_p3 }
  0x10   :  { %539 = shalt.err (!%p536_p7)
}
  0x11   :  { %s613_s25 = smov 64   ;;  %s614_s26 = smov 4  }
  0x12   :  { %33 = dma.hbm_to_vmem [thread:$0]  %s726_s1, 2304, %s28_s16, [#allocation6], %s613_s25, %s613_s25, %s614_s26  }
  0x13   :  { %s615_s29 = smov [#allocation2]   ;;  %s616_s5 = smov [#allocation7]  }
  0x14   :  { %s18_s30 = sshll.u32 %s615_s29, 4  ;;  %s40_s6 = sshll.u32 %s616_s5, 4  ;;  %s19_s30 = int_to_ptr.vmem [resolvable:$true] %s18_s30  ;;  %s41_s6 = int_to_ptr.vmem [resolvable:$true] %s40_s6 }
  0x15   :  { %s540_s9 = scalar_lea.hbm %s725_s0, 128 }
  0x16   :  { %p541_p8 = scmp.ne.s32.totalorder %s725_s0, %s540_s9  ;;  %p544_p9 = scmp.lt.u32.totalorder %s540_s9, %s725_s0 }
  0x18   :  { %p546_p10 = pnand %p544_p9, %p541_p8 }
  0x1a   :  { %549 = shalt.err (!%p546_p10)
}
  0x1b   :  { %s550_s1 = scalar_lea.vmem %s19_s30, 128  ;;  %p555_p12 = scmp.lt.s32.totalorder %s19_s30, %s19_s30 }
  0x1c   :  { %p551_p11 = scmp.ne.s32.totalorder %s19_s30, %s550_s1  ;;  %p556_p13 = scmp.lt.s32.totalorder %s550_s1, %s550_s1 }
  0x1e   :  { %p557_p0 = por %p556_p13, %p555_p12 }
  0x20   :  { %p558_p1 = pnand %p557_p0, %p551_p11 }
  0x22   :  { %561 = shalt.err (!%p558_p1)
}
  0x23   :  { %21 = dma.hbm_to_vmem [thread:$0]  %s725_s0, 128, %s19_s30, [#allocation3]  }
  0x24   :  { %s562_s18 = scalar_lea.hbm %s727_s2, 64 }
  0x25   :  { %p563_p2 = scmp.ne.s32.totalorder %s727_s2, %s562_s18  ;;  %p566_p3 = scmp.lt.u32.totalorder %s562_s18, %s727_s2 }
  0x27   :  { %p568_p4 = pnand %p566_p3, %p563_p2 }
  0x29   :  { %571 = shalt.err (!%p568_p4)
}
  0x2a   :  { %s572_s23 = scalar_lea.vmem %s41_s6, 64  ;;  %p577_p6 = scmp.lt.s32.totalorder %s41_s6, %s41_s6 }
  0x2b   :  { %p573_p5 = scmp.ne.s32.totalorder %s41_s6, %s572_s23  ;;  %p578_p7 = scmp.lt.s32.totalorder %s572_s23, %s572_s23 }
  0x2d   :  { %p579_p8 = por %p578_p7, %p577_p6 }
  0x2f   :  { %p580_p9 = pnand %p579_p8, %p573_p5 }
  0x31   :  { %583 = shalt.err (!%p580_p9)
}
  0x32   :  { %43 = dma.hbm_to_vmem [thread:$0]  %s727_s2, 64, %s41_s6, [#allocation6]  }
  0x33   :  { %606 = dma.done.wait [#allocation3], 128  }
  0x34   :  { %607 = vsyncadd [#allocation3], 4294967168 }
  0x35   :  { %608 = dma.done.wait [#allocation6], 2368  }
  0x36   :  { %609 = vsyncadd [#allocation6], 4294964928  ;;  %v617_v0 = vmov 0.0   ;;  %vm618_vm0 = vmmov 0   ;;  %v498_v1 = vld [vmem:[#allocation5] sm:$0xff]   ;;  %v499_v2 = vld [vmem:[#allocation5 + $0x8] sm:$0xff]   ;;  %v96_v19 = vlaneseq }
  0x37   :  { %439 = vmatprep.subr.bf16.mxu0 %v617_v0  ;;  %443 = vmatprep.mubr.msk.bf16.mxu0 %vm618_vm0, %v617_v0  ;;  %v56_v3 = vld [vmem:[#allocation2] sm:$0xff]  ;;  %v500_v4 = vld [vmem:[#allocation5 + $0x10] sm:$0xff]   ;;  %vm112_vm1 = vcmask 261120   ;;  %v502_v7 = vld [vmem:[#allocation5 + $0x20] sm:$0xff]   ;;  %s619_s2 = smov 16   ;;  %s620_s27 = smov 112  }
  0x38   :  { %447 = vmatprep.subr.bf16.mxu1 %v617_v0  ;;  %463 = vmatprep.mubr.msk.bf16.mxu1 %vm618_vm0, %v617_v0  ;;  %v57_v5 = vpack.c.bf16 %v56_v3, %v56_v3  ;;  %v501_v6 = vld [vmem:[#allocation5 + $0x18] sm:$0xff]   ;;  %v503_v8 = vld [vmem:[#allocation5 + $0x28] sm:$0xff]   ;;  %v504_v9 = vld [vmem:[#allocation5 + $0x30] sm:$0xff]   ;;  %v97_v20 = vshrl.u32 %v96_v19, 7  ;;  %vm368_vm2 = vcmask 130048   ;;  %vm378_vm3 = vcmask 392192  }
  0x39   :  { %440 = vmatpush3.bf16.msra.mxu0 %v498_v1  ;;  %448 = vmatpush3.bf16.msra.mxu1 %v500_v4  ;;  %v505_v10 = vld [vmem:[#allocation5 + $0x38] sm:$0xff]   ;;  %v506_v11 = vld [vmem:[#allocation5 + $0x40] sm:$0xff]   ;;  %v507_v12 = vld [vmem:[#allocation5 + $0x48] sm:$0xff]   ;;  %s622_s28 = smov [#allocation8]   ;;  %vm380_vm4 = vcmask 400384  }
  0x3a   :  { %441 = vmatprep.subr.bf16.mxu0 %v617_v0  ;;  %449 = vmatprep.subr.bf16.mxu1 %v617_v0  ;;  %v508_v13 = vld [vmem:[#allocation5 + $0x50] sm:$0xff]   ;;  %v509_v14 = vld [vmem:[#allocation5 + $0x58] sm:$0xff]   ;;  %v510_v15 = vld [vmem:[#allocation5 + $0x60] sm:$0xff]   ;;  %v98_v21 = vsub.s32 0, %v97_v20  ;;  %v160_v33 = vsub.s32 1, %v97_v20  ;;  %v254_v42 = vsub.s32 2, %v97_v20 }
  0x3b   :  { %v511_v16 = vld [vmem:[#allocation5 + $0x68] sm:$0xff]   ;;  %v512_v17 = vld [vmem:[#allocation5 + $0x70] sm:$0xff]   ;;  %v513_v18 = vld [vmem:[#allocation5 + $0x78] sm:$0xff]   ;;  %s389_s29 = sshll.u32 %s622_s28, 4  ;;  %s390_s29 = int_to_ptr.vmem [resolvable:$true] %s389_s29 }
  0x3c   :  { %v94_v22 = vld [vmem:[#allocation7] sm:$0x7]  ;;  %v514_v31 = vld [vmem:[#allocation5 + $0x80] sm:$0xff]   ;;  %v515_v32 = vld [vmem:[#allocation5 + $0x88] sm:$0xff]   ;;  %s584_s30 = scalar_lea.vmem %s390_s29, 128  ;;  %p589_p11 = scmp.lt.s32.totalorder %s390_s29, %s390_s29 }
  0x3d   :  { %442 = vmatpush3.bf16.msra.mxu0 %v499_v2  ;;  %450 = vmatpush3.bf16.msra.mxu1 %v501_v6  ;;  %v99_v23 = vrot.slane %v94_v22, %v98_v21  ;;  %v161_v34 = vrot.slane %v94_v22, %v160_v33  ;;  %v255_v43 = vrot.slane %v94_v22, %v254_v42  ;;  %v95_v50 = vld [vmem:[%s728_s3] sm:$0xff]  ;;  %s621_s3 = smov 32   ;;  %p585_p10 = scmp.ne.s32.totalorder %s390_s29, %s584_s30 }
  0x3e   :  { %467 = vmatprep.subr.bf16.mxu0 %v617_v0  ;;  %451 = vmatprep.subr.bf16.mxu1 %v617_v0  ;;  %p590_p12 = scmp.lt.s32.totalorder %s584_s30, %s584_s30 }
  0x40   :  { %444 = vmatmul.mubr.msk.bf16.vlgmr.msra.gmra.mrb[0].mxu0 %vm112_vm1, %v57_v5  ;;  %p591_p13 = por %p590_p12, %p589_p11 }
  0x41   :  { %483 = vmatprep.mubr.msk.bf16.mxu0 %vm618_vm0, %v617_v0  ;;  %452 = vmatpush3.bf16.msra.mxu1 %v502_v7 }
  0x42   :  { %453 = vmatprep.subr.bf16.mxu1 %v617_v0  ;;  %468 = vmatpush3.bf16.msra.mxu0 %v508_v13  ;;  %p592_p0 = pnand %p591_p13, %p585_p10 }
  0x43   :  { %469 = vmatprep.subr.bf16.mxu0 %v617_v0 }
  0x45   :  { %454 = vmatpush3.bf16.msra.mxu1 %v503_v8 }
  0x46   :  { %455 = vmatprep.subr.bf16.mxu1 %v617_v0  ;;  %470 = vmatpush3.bf16.msra.mxu0 %v509_v14 }
  0x47   :  { %471 = vmatprep.subr.bf16.mxu0 %v617_v0 }
  0x49   :  { %456 = vmatpush3.bf16.msra.mxu1 %v504_v9 }
  0x4a   :  { %457 = vmatprep.subr.bf16.mxu1 %v617_v0  ;;  %472 = vmatpush3.bf16.msra.mxu0 %v510_v15 }
  0x4b   :  { %473 = vmatprep.subr.bf16.mxu0 %v617_v0 }
  0x4d   :  { %458 = vmatpush3.bf16.msra.mxu1 %v505_v10 }
  0x4e   :  { %459 = vmatprep.subr.bf16.mxu1 %v617_v0  ;;  %474 = vmatpush3.bf16.msra.mxu0 %v511_v16 }
  0x4f   :  { %475 = vmatprep.subr.bf16.mxu0 %v617_v0 }
  0x51   :  { %460 = vmatpush3.bf16.msra.mxu1 %v506_v11 }
  0x52   :  { %461 = vmatprep.subr.bf16.mxu1 %v617_v0  ;;  %476 = vmatpush3.bf16.msra.mxu0 %v512_v17 }
  0x53   :  { %477 = vmatprep.subr.bf16.mxu0 %v617_v0 }
  0x55   :  { %462 = vmatpush3.bf16.msra.mxu1 %v507_v12 }
  0x56   :  { %478 = vmatpush3.bf16.msra.mxu0 %v513_v18 }
  0x57   :  { %479 = vmatprep.subr.bf16.mxu0 %v617_v0 }
  0x5a   :  { %480 = vmatpush3.bf16.msra.mxu0 %v514_v31 }
  0x5b   :  { %481 = vmatprep.subr.bf16.mxu0 %v617_v0 }
  0x5e   :  { %482 = vmatpush3.bf16.msra.mxu0 %v515_v32 }
 0x113   :  { %v150_v24 = vpop.f32.mrb[0].mxu0 }
 0x114   :  { %v151_v25 = vadd.f32 %v150_v24, %v99_v23  ;;  %v445_v26 = vpop.f32.mrb[1].mxu0 }
 0x115   :  { %v153_v27 = vpop.f32.mrb[2].mxu0 }
 0x116   :  { %v156_v28 = vmax.f32 %v151_v25, 0.0  ;;  %v446_v29 = vpop.f32.mrb[3].mxu0 }
 0x118   :  { %v157_v30 = vpack.c.bf16 %v156_v28, %v156_v28 }
 0x11a   :  { %464 = vmatmul.mubr.bf16.vlgmr.msra.gmra.mrb[0].mxu1 %v157_v30 }
 0x1ed   :  { %v244_v35 = vpop.f32.mrb[0].mxu1 }
 0x1ee   :  { %v245_v36 = vadd.f32 %v244_v35, %v161_v34  ;;  %v465_v37 = vpop.f32.mrb[1].mxu1 }
 0x1ef   :  { %v247_v38 = vpop.f32.mrb[2].mxu1 }
 0x1f0   :  { %v250_v39 = vmax.f32 %v245_v36, 0.0  ;;  %v466_v40 = vpop.f32.mrb[3].mxu1 }
 0x1f2   :  { %v251_v41 = vpack.c.bf16 %v250_v39, %v250_v39 }
 0x1f4   :  { %484 = vmatmul.mubr.bf16.vlgmr.msra.gmra.mrb[4].mxu0 %v251_v41 }
 0x2c7   :  { %v338_v44 = vpop.f32.mrb[4].mxu0 }
 0x2c8   :  { %v339_v45 = vadd.f32 %v338_v44, %v255_v43  ;;  %v485_v46 = vpop.f32.mrb[5].mxu0 }
 0x2c9   :  { %v341_v47 = vpop.f32.mrb[6].mxu0 }
 0x2ca   :  { %v486_v48 = vpop.f32.mrb[7].mxu0  ;;  %v355_v49 = vmul.f32 %v339_v45, %v339_v45  ;;  %v361_v51 = vmul.f32 1.442695, %v339_v45  ;;  %v354_v52 = vadd.f32 1.0, %v339_v45 }
 0x2cc   :  { %357 = vrot.lane.b32.xlu0 %v355_v49, %s619_s2  ;;  %516 = vpow2.f32 %v361_v51 }
 0x2d0   :  { %345 = vrot.lane.b32.xlu0 %v95_v50, %s619_s2 }
 0x2d6   :  { %v517_v55 = vpop.eup %516 }
 0x33e   :  { %v358_v53 = vpop.permute.xlu0 %357 }
 0x33f   :  { %v360_v54 = vsub.f32 %v354_v52, %v358_v53 }
 0x341   :  { %v363_v56 = vsub.f32 %v360_v54, %v517_v55 }
 0x342   :  { %v346_v57 = vpop.permute.xlu0 %345 }
 0x343   :  { %365 = vrot.lane.b32.xlu1 %v363_v56, %s620_s27  ;;  %v348_v58 = vmul.f32 %v346_v57, %v339_v45 }
 0x347   :  { %350 = vrot.lane.b32.xlu1 %v348_v58, %s620_s27 }
 0x3b5   :  { %v366_v59 = vpop.permute.xlu1 %365 }
 0x3b6   :  { %v369_v60 = vsel %vm368_vm2, %v366_v59, 0.0 }
 0x3b7   :  { %370 = vadd.xlane.f32.xlu0 %v369_v60 }
 0x3b9   :  { %v351_v61 = vpop.permute.xlu1 %350 }
 0x3ba   :  { %v353_v62 = vadd.f32 %v351_v61, %v339_v45 }
 0x3bc   :  { %374 = vrot.lane.b32.xlu1 %v353_v62, %s621_s3 }
 0x42e   :  { %v375_v63 = vpop.permute.xlu1 %374 }
 0x42f   :  { %v377_v2 = vsel %vm112_vm1, %v339_v45, %v375_v63 }
 0x444   :  { %v371_v0 = vpop.xlane.xlu0 %370 }
 0x445   :  { %v372_v1 = vmul.f32 -0.5, %v371_v0 }
 0x447   :  { %v379_v3 = vsel %vm378_vm3, %v377_v2, %v372_v1 }
 0x448   :  { %v381_v4 = vsel %vm380_vm4, %v379_v3, 0.0 }
 0x449   :  { %382 = vst [vmem:[#allocation8] sm:$0xff] %v381_v4 }
 0x44a   :  { %595 = shalt.err (!%p592_p0)
}
 0x44b   :  { %s596_s7 = scalar_lea.hbm %s729_s4, 128 }
 0x44c   :  { %p597_p1 = scmp.ne.s32.totalorder %s729_s4, %s596_s7  ;;  %p600_p2 = scmp.lt.u32.totalorder %s596_s7, %s729_s4 }
 0x44e   :  { %p602_p3 = pnand %p600_p2, %p597_p1 }
 0x450   :  { %605 = shalt.err (!%p602_p3)
}
 0x451   :  { %392 = dma.vmem_to_hbm [thread:$0]  %s390_s29, 128, %s729_s4, [#allocation4]  }
 0x452   :  { %610 = dma.done.wait [#allocation4], 128  }
 0x453   :  { %611 = vsyncadd [#allocation4], 4294967168 }
 0x454   :  { %396 = vsyncpa [#allocation3], 1 }
 0x455   :  { %397 = vsyncpa [#allocation6], 1 }
 0x456   :  { %398 = vsyncpa [#allocation4], 1 }

</bundles_post_ra>
